<compile_context>
chip_gen: v5e
topology: v5e:2x2
jax: 0.10.0
libtpu: 0.0.40
codegen_flags: <defaults>
</compile_context>

<pallas_src>
import math

import jax
import jax.numpy as jnp
from jax.experimental import pallas as pl
from jax.experimental.pallas import tpu as pltpu


def _round_up(x, m):
    return (x + m - 1) // m * m


def _fcnet1_fused_kernel(x_ref, w_ref, b_ref, scale_ref, o_ref):
    """Fused forward pass over all layers.

    x_ref:     (Bp, Dp)        VMEM  zero-padded input
    w_ref:     (L, Dp, Dp)     VMEM  per-layer weights, pre-transposed to
                                      (in_dim, out_dim), zero-padded
    b_ref:     (L, 1, Dp)      VMEM  per-layer bias, zero-padded
    scale_ref: (L,)            SMEM  per-layer weight-norm scale g / ||v||_F
    o_ref:     (Bp, Dp)        VMEM  zero-padded output
    """
    h = x_ref[...].astype(jnp.float32)
    n_layers = w_ref.shape[0]
    # Static (unrolled) layer loop; each layer: MXU matmul + fused VPU epilogue.
    for l in range(n_layers):
        y = jnp.dot(h, w_ref[l], preferred_element_type=jnp.float32)
        y = y * scale_ref[l] + b_ref[l]
        h = jnp.maximum(y, 0.0)
    o_ref[...] = h.astype(o_ref.dtype)


def prepare_fcnet1_params(params):
    """Pack per-layer (v, b, g) into padded, transposed, stacked arrays.

    Done once (outside the hot path).  Zero padding keeps the Frobenius norm
    and the matmul results on the valid region unchanged.
    """
    n_layers = len(params)
    all_dims = [params[0][0].shape[1]] + [v.shape[0] for v, _, _ in params]
    dp = _round_up(max(all_dims), 128)

    w_stack = jnp.zeros((n_layers, dp, dp), jnp.float32)
    b_stack = jnp.zeros((n_layers, 1, dp), jnp.float32)
    g_stack = jnp.zeros((n_layers,), jnp.float32)
    for l, (v, b, g) in enumerate(params):
        out_dim, in_dim = v.shape
        w_stack = w_stack.at[l, :in_dim, :out_dim].set(v.T.astype(jnp.float32))
        b_stack = b_stack.at[l, 0, :out_dim].set(b.astype(jnp.float32))
        g_stack = g_stack.at[l].set(jnp.reshape(g, ()).astype(jnp.float32))
    return {
        "w": w_stack,
        "b": b_stack,
        "g": g_stack,
        "in_dim": all_dims[0],
        "out_dim": all_dims[-1],
    }


def fcnet1_forward(x, packed):
    """FCNet1.forward: every layer is weight-normed Linear followed by ReLU."""
    w_stack, b_stack, g_stack = packed["w"], packed["b"], packed["g"]
    in_dim, out_dim = packed["in_dim"], packed["out_dim"]
    batch = x.shape[0]
    dp = w_stack.shape[-1]
    bp = _round_up(max(batch, 8), 8)

    # weight_norm(dim=None): scale = g / ||v||_F.  Hoisted out of the kernel as
    # a tiny XLA reduction (zero padding does not change the norm).
    scale = g_stack / jnp.sqrt(jnp.sum(w_stack * w_stack, axis=(1, 2)))

    # Lane-dense, zero-padded input slab.
    x_pad = jnp.zeros((bp, dp), x.dtype).at[:batch, :in_dim].set(x)

    y_pad = pl.pallas_call(
        _fcnet1_fused_kernel,
        out_shape=jax.ShapeDtypeStruct((bp, dp), x.dtype),
        in_specs=[
            pl.BlockSpec(memory_space=pltpu.MemorySpace.VMEM),   # x_pad
            pl.BlockSpec(memory_space=pltpu.MemorySpace.VMEM),   # w_stack
            pl.BlockSpec(memory_space=pltpu.MemorySpace.VMEM),   # b_stack
            pl.BlockSpec(memory_space=pltpu.MemorySpace.SMEM),   # scales
        ],
        out_specs=pl.BlockSpec(memory_space=pltpu.MemorySpace.VMEM),
    )(x_pad, w_stack, b_stack, scale)

    return y_pad[:batch, :out_dim]


def init_fcnet1_params(key, dims):
    """Deterministic init mimicking PyTorch Linear + weight_norm(dim=None).

    PyTorch: v ~ kaiming_uniform(a=sqrt(5)), b ~ U(-1/sqrt(in), 1/sqrt(in)),
             g initialized to ||v||_F so that w_eff == v at init.
    """
    params = []
    for i in range(len(dims) - 1):
        in_dim, out_dim = dims[i], dims[i + 1]
        key, kw, kb = jax.random.split(key, 3)
        bound_w = math.sqrt(1.0 / in_dim) * math.sqrt(3.0)
        v = jax.random.uniform(
            kw, (out_dim, in_dim), jnp.float32, minval=-bound_w, maxval=bound_w
        )
        bound_b = 1.0 / math.sqrt(in_dim)
        b = jax.random.uniform(
            kb, (out_dim,), jnp.float32, minval=-bound_b, maxval=bound_b
        )
        g = jnp.sqrt(jnp.sum(v * v)).reshape((1,))
        params.append((v, b, g))
    return params


def fcnet1_reference(x, params):
    """Pure-JAX reference (matches the PyTorch module with dropout=0)."""
    for v, b, g in params:
        w = g[0] * v / jnp.sqrt(jnp.sum(v * v))
        x = jnp.maximum(x @ w.T + b, 0.0)
    return x


if __name__ == "__main__":
    # dims as the PyTorch module would receive, e.g. FCNet1([16, 32, 8]).
    # Dropout defaults to 0 in the module (identity), so it is not implemented.
    dims = [16, 32, 8]
    batch = 4

    key = jax.random.PRNGKey(0)
    key, kx = jax.random.split(key)
    x = jax.random.normal(kx, (batch, dims[0]), jnp.float32)

    params = init_fcnet1_params(key, dims)
    packed = prepare_fcnet1_params(params)

    out = fcnet1_forward(x, packed)
    out = jax.block_until_ready(out)

    ref = fcnet1_reference(x, params)
    assert out.shape == (batch, dims[-1])
    assert jnp.allclose(out, ref, atol=1e-5, rtol=1e-5), "mismatch vs reference"

    print("KERNEL_OK")
</pallas_src>

<mosaic_0001>
module attributes {stable_mosaic.version = 11 : i64} {
  func.func @_fcnet1_fused_kernel(%arg0: memref<8x128xf32, #tpu.memory_space<vmem>>, %arg1: memref<2x128x128xf32, #tpu.memory_space<vmem>>, %arg2: memref<2x1x128xf32, #tpu.memory_space<vmem>>, %arg3: memref<2xf32, #tpu.memory_space<smem>>, %arg4: memref<8x128xf32, #tpu.memory_space<vmem>>) attributes {dimension_semantics = [], scalar_prefetch = 0 : i64, scratch_operands = 0 : i64, tpu.core_type = #tpu.core_type<tc>} {
    %c0 = arith.constant 0 : index
    %c0_0 = arith.constant 0 : index
    %0 = vector.load %arg0[%c0, %c0_0] : memref<8x128xf32, #tpu.memory_space<vmem>>, vector<8x128xf32>
    %c0_1 = arith.constant 0 : index
    %c0_2 = arith.constant 0 : index
    %c0_3 = arith.constant 0 : index
    %1 = vector.load %arg1[%c0_1, %c0_2, %c0_3] : memref<2x128x128xf32, #tpu.memory_space<vmem>>, vector<1x128x128xf32>
    %2 = vector.shape_cast %1 : vector<1x128x128xf32> to vector<128x128xf32>
    %cst = arith.constant dense<0.000000e+00> : vector<8x128xf32>
    %3 = tpu.matmul %0, %2, %cst {dimension_numbers = #tpu.dot_dimension_numbers<[1], [0], [0], [1], [0, 0, 1, 1], [], []>} : vector<8x128xf32>, vector<128x128xf32>, vector<8x128xf32> -> vector<8x128xf32>
    %c0_4 = arith.constant 0 : index
    %4 = memref.load %arg3[%c0_4] : memref<2xf32, #tpu.memory_space<smem>>
    %5 = vector.broadcast %4 : f32 to vector<8x128xf32>
    %6 = arith.mulf %3, %5 : vector<8x128xf32>
    %c0_5 = arith.constant 0 : index
    %c0_6 = arith.constant 0 : index
    %c0_7 = arith.constant 0 : index
    %7 = vector.load %arg2[%c0_5, %c0_6, %c0_7] : memref<2x1x128xf32, #tpu.memory_space<vmem>>, vector<1x1x128xf32>
    %8 = vector.shape_cast %7 : vector<1x1x128xf32> to vector<1x128xf32>
    %9 = vector.broadcast %8 : vector<1x128xf32> to vector<8x128xf32>
    %10 = arith.addf %6, %9 : vector<8x128xf32>
    %cst_8 = arith.constant 0.000000e+00 : f32
    %11 = vector.broadcast %cst_8 : f32 to vector<8x128xf32>
    %12 = arith.maximumf %10, %11 : vector<8x128xf32>
    %c1 = arith.constant 1 : index
    %c0_9 = arith.constant 0 : index
    %c0_10 = arith.constant 0 : index
    %13 = vector.load %arg1[%c1, %c0_9, %c0_10] : memref<2x128x128xf32, #tpu.memory_space<vmem>>, vector<1x128x128xf32>
    %14 = vector.shape_cast %13 : vector<1x128x128xf32> to vector<128x128xf32>
    %cst_11 = arith.constant dense<0.000000e+00> : vector<8x128xf32>
    %15 = tpu.matmul %12, %14, %cst_11 {dimension_numbers = #tpu.dot_dimension_numbers<[1], [0], [0], [1], [0, 0, 1, 1], [], []>} : vector<8x128xf32>, vector<128x128xf32>, vector<8x128xf32> -> vector<8x128xf32>
    %c1_12 = arith.constant 1 : index
    %16 = memref.load %arg3[%c1_12] : memref<2xf32, #tpu.memory_space<smem>>
    %17 = vector.broadcast %16 : f32 to vector<8x128xf32>
    %18 = arith.mulf %15, %17 : vector<8x128xf32>
    %c1_13 = arith.constant 1 : index
    %c0_14 = arith.constant 0 : index
    %c0_15 = arith.constant 0 : index
    %19 = vector.load %arg2[%c1_13, %c0_14, %c0_15] : memref<2x1x128xf32, #tpu.memory_space<vmem>>, vector<1x1x128xf32>
    %20 = vector.shape_cast %19 : vector<1x1x128xf32> to vector<1x128xf32>
    %21 = vector.broadcast %20 : vector<1x128xf32> to vector<8x128xf32>
    %22 = arith.addf %18, %21 : vector<8x128xf32>
    %cst_16 = arith.constant 0.000000e+00 : f32
    %23 = vector.broadcast %cst_16 : f32 to vector<8x128xf32>
    %24 = arith.maximumf %22, %23 : vector<8x128xf32>
    %c0_17 = arith.constant 0 : index
    %c0_18 = arith.constant 0 : index
    %25 = vector.load %arg4[%c0_17, %c0_18] : memref<8x128xf32, #tpu.memory_space<vmem>>, vector<8x128xf32>
    tpu.vector_store %arg4[%c0_17, %c0_18], %24 {strides = array<i32>} : memref<8x128xf32, #tpu.memory_space<vmem>>, vector<8x128xf32>,
    return
  }
}

</mosaic_0001>

<bundles_post_ra>
// kernel: tpu_custom_call.1
= control target key start
LH: loop header
LB: loop body
LE: loop exit
PB: predicated region body
PF: predicated region fallthrough
CT: control target
= control target key end

     0   :  { %9 = vsyncpa [#allocation3], 0  ;;  %s366_s0 = inlined_call_operand.hbm [shape: f32[8,128], index: 0, kind: input, shape index: {}]   ;;  %s367_s1 = inlined_call_operand.hbm [shape: f32[2,128,128], index: 1, kind: input, shape index: {}]   ;;  %s368_s2 = inlined_call_operand.hbm [shape: f32[2,1,128], index: 2, kind: input, shape index: {}]   ;;  %s369_s3 = inlined_call_operand.vmem [shape: f32[2], index: 3, kind: input, shape index: {}]   ;;  %s370_s4 = inlined_call_operand.hbm [shape: f32[8,128], index: 4, kind: output, shape index: {}]  }
   0x1   :  { %10 = vsyncpa [#allocation7], 0 }
   0x2   :  { %11 = vsyncpa [#allocation5], 0  ;;  %s28_s17 = sshll.u32 %s367_s1, 4  ;;  %s29_s17 = int_to_ptr.hbm [resolvable:$true] %s28_s17 }
   0x3   :  { %12 = vsyncpa [#allocation4], 0  ;;  %s317_s18 = smov [#allocation6]   ;;  %s18_s22 = sshll.u32 %s366_s0, 4  ;;  %s19_s22 = int_to_ptr.hbm [resolvable:$true] %s18_s22 }
   0x4   :  { %s30_s19 = sshll.u32 %s317_s18, 4  ;;  %s318_s23 = smov 128   ;;  %s31_s19 = int_to_ptr.vmem [resolvable:$true] %s30_s19 }
   0x5   :  { %s319_s24 = smov 8   ;;  %s320_s25 = smov [#allocation2]  }
   0x6   :  { %36 = dma.hbm_to_vmem [thread:$0]  %s29_s17, 4096, %s31_s19, [#allocation7], %s318_s23, %s318_s23, %s319_s24  }
   0x7   :  { %s20_s26 = sshll.u32 %s320_s25, 4  ;;  %s41_s29 = sshll.u32 %s368_s2, 4  ;;  %s21_s26 = int_to_ptr.vmem [resolvable:$true] %s20_s26  ;;  %s42_s29 = int_to_ptr.hbm [resolvable:$true] %s41_s29 }
   0x8   :  { %23 = dma.hbm_to_vmem [thread:$0]  %s19_s22, 128, %s21_s26, [#allocation3]  }
   0x9   :  { %s321_s1 = smov [#allocation8]   ;;  %s55_s0 = sshll.u32 %s369_s3, 4  ;;  %s56_s0 = int_to_ptr.vmem [resolvable:$true] %s55_s0 }
   0xa   :  { %s43_s30 = sshll.u32 %s321_s1, 4  ;;  %s322_s7 = smov 16   ;;  %s44_s30 = int_to_ptr.vmem [resolvable:$true] %s43_s30 }
   0xb   :  { %s323_s8 = smov 1   ;;  %s324_s9 = smov [#allocation9]  }
   0xc   :  { %49 = dma.hbm_to_vmem [thread:$0]  %s42_s29, 32, %s44_s30, [#allocation7], %s322_s7, %s322_s7, %s323_s8  }
   0xd   :  { %58 = dma.vmem_to_smem %s56_s0, 16, %s324_s9, [#allocation5]  }
   0xe   :  { %309 = dma.done.wait [#allocation3], 128  }
   0xf   :  { %310 = vsyncadd [#allocation3], 4294967168 }
  0x10   :  { %311 = dma.done.wait [#allocation7], 4128  }
  0x11   :  { %312 = vsyncadd [#allocation7], 4294963168 }
  0x12   :  { %313 = dma.done.wait [#allocation5], 16  }
  0x13   :  { %314 = vsyncadd [#allocation5], 4294967280 }
  0x14   :  { %75 = sfence }
  0x15   :  { %v92_v0 = vld [vmem:[#allocation6 + $0x78] sm:$0xff]  ;;  %v91_v1 = vld [vmem:[#allocation6 + $0x70] sm:$0xff]  ;;  %v90_v2 = vld [vmem:[#allocation6 + $0x68] sm:$0xff]  ;;  %s113_s2 = sld [smem:[#allocation9]]  ;;  %s325_s10 = smov [#allocation10]  }
  0x16   :  { %93 = vmatpush.msra.mxu0 %v92_v0  ;;  %v89_v3 = vld [vmem:[#allocation6 + $0x60] sm:$0xff]  ;;  %v138_v4 = vld [vmem:[#allocation6 + $0xf8] sm:$0xff]  ;;  %v137_v6 = vld [vmem:[#allocation6 + $0xf0] sm:$0xff]  ;;  %s189_s3 = sld [smem:[#allocation9 + $0x1]]  ;;  %s175_s11 = sshll.u32 %s325_s10, 4  ;;  %s176_s11 = int_to_ptr.vmem [resolvable:$true] %s175_s11 }
  0x17   :  { %v88_v5 = vld [vmem:[#allocation6 + $0x58] sm:$0xff]  ;;  %139 = vmatpush.msra.mxu1 %v138_v4  ;;  %v136_v7 = vld [vmem:[#allocation6 + $0xe8] sm:$0xff]  ;;  %v87_v8 = vld [vmem:[#allocation6 + $0x50] sm:$0xff]  ;;  %s177_s14 = sshll.u32 %s370_s4, 4  ;;  %s178_s14 = int_to_ptr.hbm [resolvable:$true] %s177_s14 }
  0x18   :  { %94 = vmatpush.msra.mxu0 %v91_v1  ;;  %v135_v9 = vld [vmem:[#allocation6 + $0xe0] sm:$0xff]  ;;  %v86_v10 = vld [vmem:[#allocation6 + $0x48] sm:$0xff]  ;;  %v134_v11 = vld [vmem:[#allocation6 + $0xd8] sm:$0xff] }
  0x19   :  { %140 = vmatpush.msra.mxu1 %v137_v6  ;;  %v85_v12 = vld [vmem:[#allocation6 + $0x40] sm:$0xff]  ;;  %v133_v13 = vld [vmem:[#allocation6 + $0xd0] sm:$0xff]  ;;  %v84_v14 = vld [vmem:[#allocation6 + $0x38] sm:$0xff] }
  0x1a   :  { %95 = vmatpush.msra.mxu0 %v90_v2  ;;  %v132_v15 = vld [vmem:[#allocation6 + $0xc8] sm:$0xff]  ;;  %v83_v16 = vld [vmem:[#allocation6 + $0x30] sm:$0xff]  ;;  %v131_v17 = vld [vmem:[#allocation6 + $0xc0] sm:$0xff] }
  0x1b   :  { %141 = vmatpush.msra.mxu1 %v136_v7  ;;  %v82_v18 = vld [vmem:[#allocation6 + $0x28] sm:$0xff]  ;;  %v130_v19 = vld [vmem:[#allocation6 + $0xb8] sm:$0xff]  ;;  %v81_v20 = vld [vmem:[#allocation6 + $0x20] sm:$0xff]  ;;  %v114_v33 = vstv %s113_s2 }
  0x1c   :  { %96 = vmatpush.msra.mxu0 %v89_v3  ;;  %v129_v21 = vld [vmem:[#allocation6 + $0xb0] sm:$0xff]  ;;  %v80_v22 = vld [vmem:[#allocation6 + $0x18] sm:$0xff]  ;;  %v128_v23 = vld [vmem:[#allocation6 + $0xa8] sm:$0xff]  ;;  %v160_v39 = vstv %s189_s3 }
  0x1d   :  { %142 = vmatpush.msra.mxu1 %v135_v9  ;;  %v79_v24 = vld [vmem:[#allocation6 + $0x10] sm:$0xff]  ;;  %v127_v25 = vld [vmem:[#allocation6 + $0xa0] sm:$0xff]  ;;  %v78_v26 = vld [vmem:[#allocation6 + $0x8] sm:$0xff] }
  0x1e   :  { %97 = vmatpush.msra.mxu0 %v88_v5  ;;  %v77_v27 = vld [vmem:[#allocation6] sm:$0xff]  ;;  %v76_v28 = vld [vmem:[#allocation2] sm:$0xff]  ;;  %v125_v30 = vld [vmem:[#allocation6 + $0x90] sm:$0xff] }
  0x1f   :  { %143 = vmatpush.msra.mxu1 %v134_v11  ;;  %v126_v29 = vld [vmem:[#allocation6 + $0x98] sm:$0xff]  ;;  %v124_v31 = vld [vmem:[#allocation6 + $0x88] sm:$0xff]  ;;  %v123_v32 = vld [vmem:[#allocation6 + $0x80] sm:$0xff] }
  0x20   :  { %98 = vmatpush.msra.mxu0 %v87_v8  ;;  %v199_v34 = vld [vmem:[#allocation8] ss:$0 sm:$0xff]  ;;  %v200_v40 = vld [vmem:[#allocation8 + $0x1] ss:$0 sm:$0xff] }
  0x21   :  { %144 = vmatpush.msra.mxu1 %v133_v13 }
  0x22   :  { %99 = vmatpush.msra.mxu0 %v86_v10 }
  0x23   :  { %145 = vmatpush.msra.mxu1 %v132_v15 }
  0x24   :  { %100 = vmatpush.msra.mxu0 %v85_v12 }
  0x25   :  { %146 = vmatpush.msra.mxu1 %v131_v17 }
  0x26   :  { %101 = vmatpush.msra.mxu0 %v84_v14 }
  0x27   :  { %147 = vmatpush.msra.mxu1 %v130_v19 }
  0x28   :  { %102 = vmatpush.msra.mxu0 %v83_v16 }
  0x29   :  { %148 = vmatpush.msra.mxu1 %v129_v21 }
  0x2a   :  { %103 = vmatpush.msra.mxu0 %v82_v18 }
  0x2b   :  { %149 = vmatpush.msra.mxu1 %v128_v23 }
  0x2c   :  { %104 = vmatpush.msra.mxu0 %v81_v20 }
  0x2d   :  { %150 = vmatpush.msra.mxu1 %v127_v25 }
  0x2e   :  { %105 = vmatpush.msra.mxu0 %v80_v22 }
  0x2f   :  { %151 = vmatpush.msra.mxu1 %v126_v29 }
  0x30   :  { %106 = vmatpush.msra.mxu0 %v79_v24 }
  0x31   :  { %152 = vmatpush.msra.mxu1 %v125_v30 }
  0x32   :  { %107 = vmatpush.msra.mxu0 %v78_v26 }
  0x33   :  { %153 = vmatpush.msra.mxu1 %v124_v31 }
  0x34   :  { %108 = vmatpush.msra.mxu0 %v77_v27 }
  0x35   :  { %109 = vmatmul.f32.vlgmr.msra.gmra.mxu0 %v76_v28  ;;  %154 = vmatpush.msra.mxu1 %v123_v32 }
  0xb2   :  { %v110_v35 = vpop.f32.mrf.mxu0 }
  0xb3   :  { %v115_v36 = vmul.f32 %v114_v33, %v110_v35 }
  0xb5   :  { %v120_v37 = vadd.f32 %v199_v34, %v115_v36 }
  0xb7   :  { %v121_v38 = vmax.f32 %v120_v37, 0.0 }
  0xb9   :  { %155 = vmatmul.f32.vlgmr.msra.gmra.mxu1 %v121_v38 }
 0x136   :  { %v156_v41 = vpop.f32.mrf.mxu1 }
 0x137   :  { %v161_v42 = vmul.f32 %v160_v39, %v156_v41 }
 0x139   :  { %v167_v43 = vadd.f32 %v200_v40, %v161_v42 }
 0x13b   :  { %v168_v44 = vmax.f32 %v167_v43, 0.0 }
 0x13d   :  { %169 = vst [vmem:[#allocation10] sm:$0xff] %v168_v44 }
 0x13e   :  { %180 = dma.vmem_to_hbm [thread:$0]  %s176_s11, 128, %s178_s14, [#allocation4]  }
 0x13f   :  { %315 = dma.done.wait [#allocation4], 128  }
 0x140   :  { %316 = vsyncadd [#allocation4], 4294967168 }
 0x141   :  { %185 = vsyncpa [#allocation3], 1 }
 0x142   :  { %186 = vsyncpa [#allocation7], 1 }
 0x143   :  { %187 = vsyncpa [#allocation4], 1 }
 0x144   :  { %188 = vsyncpa [#allocation5], 1 }

</bundles_post_ra>
